<compile_context>
chip_gen: v7x
topology: tpu7x:2x2x1
jax: 0.10.0
libtpu: 0.0.40
codegen_flags: <defaults>
</compile_context>

<pallas_src>
import functools

import jax
import jax.numpy as jnp
from jax import lax
from jax.experimental import pallas as pl
from jax.experimental.pallas import tpu as pltpu

CLASSES = 84            # fixed by the PyTorch module
H1, H2 = 64, 32         # net_arch = [64, 32, 'FC']


def mlp_kernel(x_ref, w1_ref, b1_ref, w2_ref, b2_ref, w3_ref, b3_ref, o_ref):
    x = x_ref[...]                                                   # (TB, 84)

    # Hidden layer 1: Linear(84, 64) + ReLU   (MXU, f32 accumulation)
    h = jnp.dot(x, w1_ref[...], preferred_element_type=jnp.float32)
    h = jnp.maximum(h + b1_ref[...], 0.0)

    # Hidden layer 2: Linear(64, 32) + ReLU
    h = jnp.dot(h.astype(w2_ref.dtype), w2_ref[...],
                preferred_element_type=jnp.float32)
    h = jnp.maximum(h + b2_ref[...], 0.0)

    # Sigmoid (applied before the final Linear, exactly as in the PyTorch module).
    # exp and the approximate reciprocal both run in the otherwise-idle EUP slot.
    h = pl.reciprocal(1.0 + jnp.exp(-h), approx=True)

    # Output head: Linear(32, 1) as an N=1 MXU matmul -> (TB, 1). Keeps the reduce
    # off the contended vex/XLU slots; stores go to the idle vst slot.
    o = lax.dot_general(h.astype(w3_ref.dtype), w3_ref[...],
                        (((1,), (0,)), ((), ())),
                        preferred_element_type=jnp.float32)          # (TB, 1)
    o_ref[...] = o + b3_ref[...]


def _round_up(n: int, m: int) -> int:
    return ((n + m - 1) // m) * m


@functools.partial(jax.jit, static_argnames=("block_rows",))
def build_model_forward(x, params, *, block_rows=8192):
    w1, b1, w2, b2, w3, b3 = params
    B = x.shape[0]

    # ---- adaptive batch tiling ---------------------------------------------------
    # Big tiles amortize the ~0.35 us per-grid-step overhead; adapt to B so the tail
    # tile does not stream/compute up to TB-1 junk rows, and keep >= 2 grid steps for
    # batches > 128 rows so v7x can shard the "parallel" axis across its 2 TensorCores.
    target = max(128, (int(block_rows) // 128) * 128)
    steps = max(1, -(-B // target))          # ceil(B / target)
    if B > 128:
        steps = max(steps, 2)
    TB = min(target, _round_up(-(-B // steps), 128))
    B_pad = _round_up(B, TB)
    if B_pad != B:
        x = jnp.pad(x, ((0, B_pad - B), (0, 0)))   # padded tail rows sliced off below

    # If the producer already hands us bf16 activations, run the matmuls in bf16
    # (weights are tiny to cast; f32 accumulation is kept via preferred_element_type).
    # NOTE: we deliberately do NOT cast x here - that would be an extra HBM pass.
    if x.dtype == jnp.bfloat16:
        w1, w2, w3 = (w.astype(jnp.bfloat16) for w in (w1, w2, w3))
    b1 = b1.reshape(1, H1).astype(jnp.float32)
    b2 = b2.reshape(1, H2).astype(jnp.float32)
    b3 = b3.reshape(1, 1).astype(jnp.float32)
    w3 = w3.reshape(H2, 1)

    const = lambda i: (0, 0)   # weights/biases: fetched once, resident across grid steps

    # Per-step VMEM (f32, lanes pad to 128): x (2 bufs) + out (2 bufs) + ~3 activation
    # temporaries ~= 7 * TB*512 B. Budget 12x for headroom, capped at 48 MiB
    # (< v7x's 64 MiB physical; v5e/v6e have 128 MiB physical).
    vmem_limit = int(min(48 * 2**20, max(16 * 2**20, 12 * TB * 512)))

    out = pl.pallas_call(
        mlp_kernel,
        out_shape=jax.ShapeDtypeStruct((B_pad, 1), jnp.float32),
        grid=(B_pad // TB,),
        in_specs=[
            pl.BlockSpec((TB, CLASSES), lambda i: (i, 0)),   # stream x, double-buffered
            pl.BlockSpec((CLASSES, H1), const),              # w1
            pl.BlockSpec((1, H1), const),                    # b1
            pl.BlockSpec((H1, H2), const),                   # w2
            pl.BlockSpec((1, H2), const),                    # b2
            pl.BlockSpec((H2, 1), const),                    # w3
            pl.BlockSpec((1, 1), const),                     # b3
        ],
        out_specs=pl.BlockSpec((TB, 1), lambda i: (i, 0)),   # (TB,1) blocks, idle vst slot
        compiler_params=pltpu.CompilerParams(
            dimension_semantics=("parallel",),               # shard batch tiles across TCs (v7x)
            vmem_limit_bytes=vmem_limit,
        ),
    )(x, w1, b1, w2, b2, w3, b3)

    return out[:B]                                           # (B, 1)


def init_params(key):
    k1, k2, k3 = jax.random.split(key, 3)
    w1 = jax.random.normal(k1, (CLASSES, H1), jnp.float32) * 0.05   # Linear(84, 64)
    b1 = jnp.zeros((1, H1), jnp.float32)
    w2 = jax.random.normal(k2, (H1, H2), jnp.float32) * 0.05        # Linear(64, 32)
    b2 = jnp.zeros((1, H2), jnp.float32)
    w3 = jax.random.normal(k3, (H2, 1), jnp.float32) * 0.05         # Linear(32, 1) ('FC' head)
    b3 = jnp.zeros((1, 1), jnp.float32)
    return (w1, b1, w2, b2, w3, b3)


def reference_forward(x, params):
    (w1, b1, w2, b2, w3, b3) = params
    h = jnp.maximum(x @ w1 + b1, 0.0)
    h = jnp.maximum(h @ w2 + b2, 0.0)
    h = jax.nn.sigmoid(h)
    return h @ w3 + b3


if __name__ == "__main__":
    key = jax.random.PRNGKey(0)
    kx, kp = jax.random.split(key)
    params = init_params(kp)

    # Small batch (pads to one 128-row tile, single grid step).
    B = 8
    x = jax.random.normal(kx, (B, CLASSES), jnp.float32)
    out = jax.block_until_ready(build_model_forward(x, params))
    ref = reference_forward(x, params)
    assert out.shape == (B, 1)
    # Tolerance covers the approximate (EUP) reciprocal inside the in-kernel sigmoid.
    assert jnp.allclose(out, ref, atol=2e-3, rtol=2e-3)

    # Non-multiple batch on the default (adaptive) tiling: 2 grid steps of 256 rows.
    B2 = 300
    x2 = jax.random.normal(jax.random.fold_in(kx, 1), (B2, CLASSES), jnp.float32)
    out2 = jax.block_until_ready(build_model_forward(x2, params))
    ref2 = reference_forward(x2, params)
    assert out2.shape == (B2, 1)
    assert jnp.allclose(out2, ref2, atol=2e-3, rtol=2e-3)

    # Force small tiles to exercise the multi-tile grid + tail-padding path (3 steps).
    out3 = jax.block_until_ready(build_model_forward(x2, params, block_rows=128))
    assert out3.shape == (B2, 1)
    assert jnp.allclose(out3, ref2, atol=2e-3, rtol=2e-3)

    print("KERNEL_OK")
</pallas_src>

<mosaic_0001>
module attributes {stable_mosaic.version = 11 : i64} {
  func.func @mlp_kernel(%arg0: i32, %arg1: memref<128x84xf32, #tpu.memory_space<vmem>>, %arg2: memref<84x64xf32, #tpu.memory_space<vmem>>, %arg3: memref<1x64xf32, #tpu.memory_space<vmem>>, %arg4: memref<64x32xf32, #tpu.memory_space<vmem>>, %arg5: memref<1x32xf32, #tpu.memory_space<vmem>>, %arg6: memref<32x1xf32, #tpu.memory_space<vmem>>, %arg7: memref<1x1xf32, #tpu.memory_space<vmem>>, %arg8: memref<128x1xf32, #tpu.memory_space<vmem>>) attributes {dimension_semantics = [#tpu.dimension_semantics<parallel>], iteration_bounds = array<i64: 1>, scalar_prefetch = 0 : i64, scratch_operands = 0 : i64, tpu.core_type = #tpu.core_type<tc>, window_params = [{transform_indices = @transform_0, window_bounds = array<i64: 128, 84>}, {pipeline_mode = #tpu.pipeline_mode<synchronous>, transform_indices = @transform_1, window_bounds = array<i64: 84, 64>}, {pipeline_mode = #tpu.pipeline_mode<synchronous>, transform_indices = @transform_2, window_bounds = array<i64: 1, 64>}, {pipeline_mode = #tpu.pipeline_mode<synchronous>, transform_indices = @transform_3, window_bounds = array<i64: 64, 32>}, {pipeline_mode = #tpu.pipeline_mode<synchronous>, transform_indices = @transform_4, window_bounds = array<i64: 1, 32>}, {pipeline_mode = #tpu.pipeline_mode<synchronous>, transform_indices = @transform_5, window_bounds = array<i64: 32, 1>}, {pipeline_mode = #tpu.pipeline_mode<synchronous>, transform_indices = @transform_6, window_bounds = array<i64: 1, 1>}, {transform_indices = @transform_7, window_bounds = array<i64: 128, 1>}]} {
    %c0 = arith.constant 0 : index
    %c0_0 = arith.constant 0 : index
    %0 = vector.load %arg1[%c0, %c0_0] : memref<128x84xf32, #tpu.memory_space<vmem>>, vector<128x84xf32>
    %c0_1 = arith.constant 0 : index
    %c0_2 = arith.constant 0 : index
    %1 = vector.load %arg2[%c0_1, %c0_2] : memref<84x64xf32, #tpu.memory_space<vmem>>, vector<84x64xf32>
    %cst = arith.constant dense<0.000000e+00> : vector<128x64xf32>
    %2 = tpu.matmul %0, %1, %cst {dimension_numbers = #tpu.dot_dimension_numbers<[1], [0], [0], [1], [0, 0, 1, 1], [], []>} : vector<128x84xf32>, vector<84x64xf32>, vector<128x64xf32> -> vector<128x64xf32>
    %c0_3 = arith.constant 0 : index
    %c0_4 = arith.constant 0 : index
    %3 = vector.load %arg3[%c0_3, %c0_4] : memref<1x64xf32, #tpu.memory_space<vmem>>, vector<1x64xf32>
    %4 = vector.broadcast %3 : vector<1x64xf32> to vector<128x64xf32>
    %5 = arith.addf %2, %4 : vector<128x64xf32>
    %cst_5 = arith.constant 0.000000e+00 : f32
    %6 = vector.broadcast %cst_5 : f32 to vector<128x64xf32>
    %7 = arith.maximumf %5, %6 : vector<128x64xf32>
    %c0_6 = arith.constant 0 : index
    %c0_7 = arith.constant 0 : index
    %8 = vector.load %arg4[%c0_6, %c0_7] : memref<64x32xf32, #tpu.memory_space<vmem>>, vector<64x32xf32>
    %cst_8 = arith.constant dense<0.000000e+00> : vector<128x32xf32>
    %9 = tpu.matmul %7, %8, %cst_8 {dimension_numbers = #tpu.dot_dimension_numbers<[1], [0], [0], [1], [0, 0, 1, 1], [], []>} : vector<128x64xf32>, vector<64x32xf32>, vector<128x32xf32> -> vector<128x32xf32>
    %c0_9 = arith.constant 0 : index
    %c0_10 = arith.constant 0 : index
    %10 = vector.load %arg5[%c0_9, %c0_10] : memref<1x32xf32, #tpu.memory_space<vmem>>, vector<1x32xf32>
    %11 = vector.broadcast %10 : vector<1x32xf32> to vector<128x32xf32>
    %12 = arith.addf %9, %11 : vector<128x32xf32>
    %cst_11 = arith.constant 0.000000e+00 : f32
    %13 = vector.broadcast %cst_11 : f32 to vector<128x32xf32>
    %14 = arith.maximumf %12, %13 : vector<128x32xf32>
    %cst_12 = arith.constant 0.000000e+00 : f32
    %15 = vector.broadcast %cst_12 : f32 to vector<128x32xf32>
    %16 = arith.subf %15, %14 : vector<128x32xf32>
    %17 = math.exp %16 : vector<128x32xf32>
    %cst_13 = arith.constant 1.000000e+00 : f32
    %18 = vector.broadcast %cst_13 : f32 to vector<128x32xf32>
    %19 = arith.addf %18, %17 : vector<128x32xf32>
    %20 = tpu.reciprocal %19 {approx = true} : vector<128x32xf32> -> vector<128x32xf32>
    %c0_14 = arith.constant 0 : index
    %c0_15 = arith.constant 0 : index
    %21 = vector.load %arg6[%c0_14, %c0_15] : memref<32x1xf32, #tpu.memory_space<vmem>>, vector<32x1xf32>
    %cst_16 = arith.constant dense<0.000000e+00> : vector<128x1xf32>
    %22 = tpu.matmul %20, %21, %cst_16 {dimension_numbers = #tpu.dot_dimension_numbers<[1], [0], [0], [1], [0, 0, 1, 1], [], []>} : vector<128x32xf32>, vector<32x1xf32>, vector<128x1xf32> -> vector<128x1xf32>
    %c0_17 = arith.constant 0 : index
    %c0_18 = arith.constant 0 : index
    %23 = vector.load %arg7[%c0_17, %c0_18] : memref<1x1xf32, #tpu.memory_space<vmem>>, vector<1x1xf32>
    %24 = vector.broadcast %23 : vector<1x1xf32> to vector<128x1xf32>
    %25 = arith.addf %22, %24 : vector<128x1xf32>
    %c0_19 = arith.constant 0 : index
    %c0_20 = arith.constant 0 : index
    %26 = vector.load %arg8[%c0_19, %c0_20] : memref<128x1xf32, #tpu.memory_space<vmem>>, vector<128x1xf32>
    tpu.vector_store %arg8[%c0_19, %c0_20], %25 {strides = array<i32>} : memref<128x1xf32, #tpu.memory_space<vmem>>, vector<128x1xf32>,
    return
  }
  func.func @transform_0(%arg0: i32) -> (i32, i32) {
    %c0_i32 = arith.constant 0 : i32
    %c0_i32_0 = arith.constant 0 : i32
    return %arg0, %c0_i32 : i32, i32
  }
  func.func @transform_1(%arg0: i32) -> (i32, i32) {
    %c0_i32 = arith.constant 0 : i32
    %c0_i32_0 = arith.constant 0 : i32
    %c0_i32_1 = arith.constant 0 : i32
    return %c0_i32, %c0_i32_0 : i32, i32
  }
  func.func @transform_2(%arg0: i32) -> (i32, i32) {
    %c0_i32 = arith.constant 0 : i32
    %c0_i32_0 = arith.constant 0 : i32
    %c0_i32_1 = arith.constant 0 : i32
    return %c0_i32, %c0_i32_0 : i32, i32
  }
  func.func @transform_3(%arg0: i32) -> (i32, i32) {
    %c0_i32 = arith.constant 0 : i32
    %c0_i32_0 = arith.constant 0 : i32
    %c0_i32_1 = arith.constant 0 : i32
    return %c0_i32, %c0_i32_0 : i32, i32
  }
  func.func @transform_4(%arg0: i32) -> (i32, i32) {
    %c0_i32 = arith.constant 0 : i32
    %c0_i32_0 = arith.constant 0 : i32
    %c0_i32_1 = arith.constant 0 : i32
    return %c0_i32, %c0_i32_0 : i32, i32
  }
  func.func @transform_5(%arg0: i32) -> (i32, i32) {
    %c0_i32 = arith.constant 0 : i32
    %c0_i32_0 = arith.constant 0 : i32
    %c0_i32_1 = arith.constant 0 : i32
    return %c0_i32, %c0_i32_0 : i32, i32
  }
  func.func @transform_6(%arg0: i32) -> (i32, i32) {
    %c0_i32 = arith.constant 0 : i32
    %c0_i32_0 = arith.constant 0 : i32
    %c0_i32_1 = arith.constant 0 : i32
    return %c0_i32, %c0_i32_0 : i32, i32
  }
  func.func @transform_7(%arg0: i32) -> (i32, i32) {
    %c0_i32 = arith.constant 0 : i32
    %c0_i32_0 = arith.constant 0 : i32
    return %arg0, %c0_i32 : i32, i32
  }
}

</mosaic_0001>

<bundles_post_ra>
// kernel: build_model_forward.1
= control target key start
LH: loop header
LB: loop body
LE: loop exit
PB: predicated region body
PF: predicated region fallthrough
CT: control target
= control target key end

     0   :  { %vm62_vm0 = vcmask 687104   ;;  %vm111_vm1 = vcmask 1043456   ;;  %vm291_vm2 = vcmask 523264   ;;  %vm592_vm3 = vcmask 261120   ;;  %s1460_s1 = inlined_call_operand.vmem [shape: f32[84,64], index: 1, kind: input, shape index: {}]   ;;  %s1461_s0 = inlined_call_operand.vmem [shape: f32[128,84], index: 0, kind: input, shape index: {}]   ;;  %s1462_s3 = inlined_call_operand.vmem [shape: f32[64,32], index: 3, kind: input, shape index: {}]   ;;  %s1463_s2 = inlined_call_operand.vmem [shape: f32[1,64], index: 2, kind: input, shape index: {}]   ;;  %s1464_s5 = inlined_call_operand.vmem [shape: f32[32,1], index: 5, kind: input, shape index: {}]   ;;  %s1465_s6 = inlined_call_operand.<no memory space> [shape: f32[1,1], index: 6, kind: input, shape index: {}]   ;;  %s1466_s4 = inlined_call_operand.vmem [shape: f32[1,32], index: 4, kind: input, shape index: {}]   ;;  %s1467_s7 = inlined_call_operand.vmem [shape: f32[128,1], index: 7, kind: output, shape index: {}]  }
   0x1   :  { %v44_v0 = vld [vmem:[%s1460_s1] sm:$0xff]  ;;  %v45_v1 = vld [vmem:[%s1460_s1 + $0x8] sm:$0xff]  ;;  %v46_v2 = vld [vmem:[%s1460_s1 + $0x10] sm:$0xff]  ;;  %vm786_vm4 = vcmask 7168  }
   0x2   :  { %v1048_v3 = vpack.c.bf16 %v45_v1, %v44_v0  ;;  %v47_v4 = vld [vmem:[%s1460_s1 + $0x18] sm:$0xff]  ;;  %v48_v6 = vld [vmem:[%s1460_s1 + $0x20] sm:$0xff]  ;;  %v49_v7 = vld [vmem:[%s1460_s1 + $0x28] sm:$0xff] }
   0x3   :  { %v1052_v5 = vpack.c.bf16 %v47_v4, %v46_v2  ;;  %v28_v8 = vld [vmem:[%s1461_s0] sm:$0xff]  ;;  %v1056_v9 = vpack.c.bf16 %v49_v7, %v48_v6  ;;  %v50_v10 = vld [vmem:[%s1460_s1 + $0x30] sm:$0xff]  ;;  %v51_v11 = vld [vmem:[%s1460_s1 + $0x38] sm:$0xff] }
   0x4   :  { %1049 = vmatprep.subr.bf16.mxu0 %v1048_v3  ;;  %952 = vmatprep.mubr.msk.f32.mxu0 %vm62_vm0, %v28_v8  ;;  %v1060_v12 = vpack.c.bf16 %v51_v11, %v50_v10  ;;  %v276_v13 = vld [vmem:[%s1462_s3] sm:$0xff]  ;;  %v277_v14 = vld [vmem:[%s1462_s3 + $0x8] sm:$0xff]  ;;  %v278_v15 = vld [vmem:[%s1462_s3 + $0x10] sm:$0xff] }
   0x5   :  { %1051 = vmatpush3.bf16.msra.mxu0 %v1048_v3  ;;  %v52_v16 = vld [vmem:[%s1460_s1 + $0x40] sm:$0xff]  ;;  %v53_v17 = vld [vmem:[%s1460_s1 + $0x48] sm:$0xff]  ;;  %v1068_v18 = vpack.c.bf16 %v277_v14, %v276_v13  ;;  %v279_v19 = vld [vmem:[%s1462_s3 + $0x18] sm:$0xff] }
   0x6   :  { %1053 = vmatprep.subr.bf16.mxu0 %v1052_v5  ;;  %v1072_v20 = vpack.c.bf16 %v279_v19, %v278_v15  ;;  %v1064_v21 = vpack.c.bf16 %v53_v17, %v52_v16  ;;  %v280_v22 = vld [vmem:[%s1462_s3 + $0x20] sm:$0xff]  ;;  %v281_v23 = vld [vmem:[%s1462_s3 + $0x28] sm:$0xff]  ;;  %v282_v25 = vld [vmem:[%s1462_s3 + $0x30] sm:$0xff] }
   0x7   :  { %1092 = vmatprep.subr.bf16.mxu1 %v1068_v18  ;;  %v1076_v24 = vpack.c.bf16 %v281_v23, %v280_v22  ;;  %v283_v26 = vld [vmem:[%s1462_s3 + $0x38] sm:$0xff]  ;;  %v54_v27 = vld [vmem:[%s1460_s1 + $0x50] sm:$0xf]  ;;  %v29_v29 = vld [vmem:[%s1461_s0 + $0x8] sm:$0xff] }
   0x8   :  { %1096 = vmatpush3.bf16.msra.mxu1 %v1068_v18  ;;  %v1080_v28 = vpack.c.bf16 %v283_v26, %v282_v25  ;;  %v30_v30 = vld [vmem:[%s1461_s0 + $0x10] sm:$0xff]  ;;  %v31_v31 = vld [vmem:[%s1461_s0 + $0x18] sm:$0xff]  ;;  %v32_v32 = vld [vmem:[%s1461_s0 + $0x20] sm:$0xff] }
   0x9   :  { %1055 = vmatpush3.bf16.msra.mxu0 %v1052_v5  ;;  %1093 = vmatprep.subr.bf16.mxu1 %v1072_v20  ;;  %v33_v33 = vld [vmem:[%s1461_s0 + $0x28] sm:$0xff]  ;;  %v34_v34 = vld [vmem:[%s1461_s0 + $0x30] sm:$0xff]  ;;  %v35_v35 = vld [vmem:[%s1461_s0 + $0x38] sm:$0xff] }
   0xa   :  { %1057 = vmatprep.subr.bf16.mxu0 %v1056_v9  ;;  %v36_v36 = vld [vmem:[%s1461_s0 + $0x40] sm:$0xff]  ;;  %v37_v37 = vld [vmem:[%s1461_s0 + $0x48] sm:$0xff]  ;;  %v38_v38 = vld [vmem:[%s1461_s0 + $0x50] sm:$0xff] }
   0xb   :  { %v39_v39 = vld [vmem:[%s1461_s0 + $0x58] sm:$0xff]  ;;  %v40_v40 = vld [vmem:[%s1461_s0 + $0x60] sm:$0xff]  ;;  %v41_v41 = vld [vmem:[%s1461_s0 + $0x68] sm:$0xff] }
   0xc   :  { %1097 = vmatpush3.bf16.msra.mxu1 %v1072_v20  ;;  %v42_v42 = vld [vmem:[%s1461_s0 + $0x70] sm:$0xff]  ;;  %v43_v43 = vld [vmem:[%s1461_s0 + $0x78] sm:$0xff]  ;;  %v807_v44 = vld [vmem:[%s1463_s2] ss:$0 sm:$0xff] }
   0xd   :  { %1059 = vmatpush3.bf16.msra.mxu0 %v1056_v9  ;;  %1094 = vmatprep.subr.bf16.mxu1 %v1076_v24 }
   0xe   :  { %1061 = vmatprep.subr.bf16.mxu0 %v1060_v12 }
  0x10   :  { %1098 = vmatpush3.bf16.msra.mxu1 %v1076_v24 }
  0x11   :  { %1063 = vmatpush3.bf16.msra.mxu0 %v1060_v12  ;;  %1095 = vmatprep.subr.bf16.mxu1 %v1080_v28 }
  0x12   :  { %1065 = vmatprep.subr.bf16.mxu0 %v1064_v21 }
  0x14   :  { %1099 = vmatpush3.bf16.msra.mxu1 %v1080_v28 }
  0x15   :  { %1067 = vmatpush3.bf16.msra.mxu0 %v1064_v21 }
  0x16   :  { %950 = vmatprep.subr.msk.mxu0 %vm111_vm1, %v54_v27 }
  0x19   :  { %951 = vmatpush3.msk.msra.mxu0 %vm111_vm1, %v54_v27 }
  0x1a   :  { %953 = vmatmul.mubr.msk.f32.vlgmr.msra.gmra.mrb[0].mxu0 %vm62_vm0, %v29_v29  ;;  %1069 = vmatprep.subr.bf16.mxu0 %v1068_v18  ;;  %v581_v29 = vld [vmem:[%s1464_s5] sm:$0xff] }
  0x1b   :  { %955 = vmatprep.mubr.msk.f32.mxu0 %vm62_vm0, %v30_v30  ;;  %1071 = vmatpush3.bf16.msra.mxu0 %v1068_v18  ;;  %v582_v30 = vld [vmem:[%s1464_s5 + $0x8] sm:$0xff] }
  0x1c   :  { %1073 = vmatprep.subr.bf16.mxu0 %v1072_v20 }
  0x1e   :  { %956 = vmatmul.mubr.msk.f32.gmra.mrb[2].mxu0 %vm62_vm0, %v31_v31  ;;  %v1084_v31 = vpack.c.bf16 %v582_v30, %v581_v29 }
  0x1f   :  { %958 = vmatprep.mubr.msk.f32.mxu0 %vm62_vm0, %v32_v32  ;;  %1075 = vmatpush3.bf16.msra.mxu0 %v1072_v20  ;;  %v583_v32 = vld [vmem:[%s1464_s5 + $0x10] sm:$0xff] }
  0x20   :  { %1077 = vmatprep.subr.bf16.mxu0 %v1076_v24  ;;  %1085 = vmatprep.subr.bf16.mxu1 %v1084_v31 }
  0x22   :  { %959 = vmatmul.mubr.msk.f32.gmra.mrb[4].mxu0 %vm62_vm0, %v33_v33  ;;  %v584_v33 = vld [vmem:[%s1464_s5 + $0x18] sm:$0xff] }
  0x23   :  { %961 = vmatprep.mubr.msk.f32.mxu0 %vm62_vm0, %v34_v34  ;;  %1079 = vmatpush3.bf16.msra.mxu0 %v1076_v24  ;;  %v1088_v34 = vpack.c.bf16 %v584_v33, %v583_v32 }
  0x24   :  { %1081 = vmatprep.subr.bf16.mxu0 %v1080_v28 }
  0x26   :  { %962 = vmatmul.mubr.msk.f32.gmra.mrb[6].mxu0 %vm62_vm0, %v35_v35  ;;  %v12_v35 = vstv %s1465_s6 }
  0x27   :  { %964 = vmatprep.mubr.msk.f32.mxu0 %vm62_vm0, %v36_v36  ;;  %1083 = vmatpush3.bf16.msra.mxu0 %v1080_v28  ;;  %13 = vst [vmem:[#allocation2] sm:$0x1] %v12_v35  ;;  %v1362_v36 = vld [vmem:[%s1466_s4] ss:$0 sm:$0xff] }
  0x2a   :  { %965 = vmatmul.mubr.msk.f32.gmra.mrb[8].mxu0 %vm62_vm0, %v37_v37 }
  0x2b   :  { %967 = vmatprep.mubr.msk.f32.mxu0 %vm62_vm0, %v38_v38 }
  0x2e   :  { %968 = vmatmul.mubr.msk.f32.gmra.mrb[10].mxu0 %vm62_vm0, %v39_v39 }
  0x2f   :  { %970 = vmatprep.mubr.msk.f32.mxu0 %vm62_vm0, %v40_v40 }
  0x32   :  { %971 = vmatmul.mubr.msk.f32.gmra.mrb[12].mxu0 %vm62_vm0, %v41_v41 }
  0x33   :  { %973 = vmatprep.mubr.msk.f32.mxu0 %vm62_vm0, %v42_v42 }
  0x36   :  { %974 = vmatmul.mubr.msk.f32.gmra.mrb[14].mxu0 %vm62_vm0, %v43_v43 }
  0xed   :  { %v954_v45 = vpop.f32.mrb[0].mxu0 }
  0xee   :  { %v187_v46 = vadd.f32 %v954_v45, %v807_v44  ;;  %v181_v47 = vpop.f32.mrb[1].mxu0 }
  0xef   :  { %v182_v48 = vadd.f32 %v807_v44, %v181_v47 }
  0xf0   :  { %v261_v51 = vmax.f32 %v187_v46, 0.0 }
  0xf1   :  { %v260_v49 = vmax.f32 %v182_v48, 0.0  ;;  %v957_v50 = vpop.f32.mrb[2].mxu0 }
  0xf2   :  { %v197_v52 = vadd.f32 %v957_v50, %v807_v44  ;;  %v191_v53 = vpop.f32.mrb[3].mxu0 }
  0xf3   :  { %v192_v54 = vadd.f32 %v807_v44, %v191_v53  ;;  %992 = vmatprep.mubr.msk.f32.mxu0 %vm291_vm2, %v260_v49 }
  0xf4   :  { %993 = vmatmul.mubr.msk.f32.vlgmr.msra.gmra.mrb[16].mxu0 %vm291_vm2, %v261_v51  ;;  %v263_v57 = vmax.f32 %v197_v52, 0.0 }
  0xf5   :  { %v262_v55 = vmax.f32 %v192_v54, 0.0  ;;  %v960_v56 = vpop.f32.mrb[4].mxu0 }
  0xf6   :  { %v207_v58 = vadd.f32 %v960_v56, %v807_v44  ;;  %v201_v59 = vpop.f32.mrb[5].mxu0 }
  0xf7   :  { %v202_v60 = vadd.f32 %v807_v44, %v201_v59  ;;  %995 = vmatprep.mubr.msk.f32.mxu0 %vm291_vm2, %v262_v55 }
  0xf8   :  { %996 = vmatmul.mubr.msk.f32.gmra.mrb[18].mxu0 %vm291_vm2, %v263_v57  ;;  %v265_v63 = vmax.f32 %v207_v58, 0.0 }
  0xf9   :  { %v264_v61 = vmax.f32 %v202_v60, 0.0  ;;  %v963_v62 = vpop.f32.mrb[6].mxu0 }
  0xfa   :  { %v217_v0 = vadd.f32 %v963_v62, %v807_v44  ;;  %v211_v1 = vpop.f32.mrb[7].mxu0 }
  0xfb   :  { %v212_v2 = vadd.f32 %v807_v44, %v211_v1  ;;  %998 = vmatprep.mubr.msk.f32.mxu0 %vm291_vm2, %v264_v61 }
  0xfc   :  { %999 = vmatmul.mubr.msk.f32.gmra.mrb[20].mxu0 %vm291_vm2, %v265_v63  ;;  %v267_v5 = vmax.f32 %v217_v0, 0.0 }
  0xfd   :  { %v266_v3 = vmax.f32 %v212_v2, 0.0  ;;  %v966_v4 = vpop.f32.mrb[8].mxu0 }
  0xfe   :  { %v227_v6 = vadd.f32 %v966_v4, %v807_v44  ;;  %v221_v7 = vpop.f32.mrb[9].mxu0 }
  0xff   :  { %v222_v8 = vadd.f32 %v807_v44, %v221_v7  ;;  %1001 = vmatprep.mubr.msk.f32.mxu1 %vm291_vm2, %v266_v3 }
 0x100   :  { %1002 = vmatmul.mubr.msk.f32.vlgmr.msra.gmra.mrb[0].mxu1 %vm291_vm2, %v267_v5  ;;  %v269_v11 = vmax.f32 %v227_v6, 0.0 }
 0x101   :  { %v268_v9 = vmax.f32 %v222_v8, 0.0  ;;  %v969_v10 = vpop.f32.mrb[10].mxu0  ;;  %1087 = vmatpush3.bf16.msra.mxu1 %v1084_v31 }
 0x102   :  { %v237_v12 = vadd.f32 %v969_v10, %v807_v44  ;;  %v231_v13 = vpop.f32.mrb[11].mxu0  ;;  %1089 = vmatprep.subr.bf16.mxu1 %v1088_v34 }
 0x103   :  { %v232_v14 = vadd.f32 %v807_v44, %v231_v13  ;;  %1004 = vmatprep.mubr.msk.f32.mxu1 %vm291_vm2, %v268_v9 }
 0x104   :  { %1005 = vmatmul.mubr.msk.f32.gmra.mrb[2].mxu1 %vm291_vm2, %v269_v11  ;;  %v271_v17 = vmax.f32 %v237_v12, 0.0 }
 0x105   :  { %v270_v15 = vmax.f32 %v232_v14, 0.0  ;;  %v972_v16 = vpop.f32.mrb[12].mxu0  ;;  %1091 = vmatpush3.bf16.msra.mxu1 %v1088_v34 }
 0x106   :  { %v247_v18 = vadd.f32 %v972_v16, %v807_v44  ;;  %v241_v19 = vpop.f32.mrb[13].mxu0 }
 0x107   :  { %v242_v20 = vadd.f32 %v807_v44, %v241_v19  ;;  %1007 = vmatprep.mubr.msk.f32.mxu1 %vm291_vm2, %v270_v15 }
 0x108   :  { %1008 = vmatmul.mubr.msk.f32.gmra.mrb[4].mxu1 %vm291_vm2, %v271_v17  ;;  %v273_v23 = vmax.f32 %v247_v18, 0.0 }
 0x109   :  { %v272_v21 = vmax.f32 %v242_v20, 0.0  ;;  %v975_v22 = vpop.f32.mrb[14].mxu0 }
 0x10a   :  { %v257_v24 = vadd.f32 %v975_v22, %v807_v44  ;;  %v251_v25 = vpop.f32.mrb[15].mxu0 }
 0x10b   :  { %v252_v26 = vadd.f32 %v807_v44, %v251_v25  ;;  %1010 = vmatprep.mubr.msk.f32.mxu1 %vm291_vm2, %v272_v21 }
 0x10c   :  { %1011 = vmatmul.mubr.msk.f32.gmra.mrb[6].mxu1 %vm291_vm2, %v273_v23  ;;  %v275_v28 = vmax.f32 %v257_v24, 0.0 }
 0x10d   :  { %v274_v27 = vmax.f32 %v252_v26, 0.0 }
 0x10f   :  { %1013 = vmatprep.mubr.msk.f32.mxu1 %vm291_vm2, %v274_v27 }
 0x110   :  { %1014 = vmatmul.mubr.msk.f32.gmra.mrb[8].mxu1 %vm291_vm2, %v275_v28 }
 0x1c7   :  { %v994_v37 = vpop.f32.mrb[16].mxu0 }
 0x1c8   :  { %v412_v38 = vadd.f32 %v994_v37, %v1362_v36  ;;  %v406_v39 = vpop.f32.mrb[17].mxu0 }
 0x1c9   :  { %v407_v40 = vadd.f32 %v1362_v36, %v406_v39 }
 0x1ca   :  { %v486_v41 = vmax.f32 %v412_v38, 0.0 }
 0x1cb   :  { %v485_v42 = vmax.f32 %v407_v40, 0.0  ;;  %v997_v43 = vpop.f32.mrb[18].mxu0 }
 0x1cc   :  { %v502_v44 = vsub.f32 0.0, %v486_v41  ;;  %v422_v45 = vadd.f32 %v997_v43, %v1362_v36  ;;  %v416_v46 = vpop.f32.mrb[19].mxu0 }
 0x1cd   :  { %v501_v47 = vsub.f32 0.0, %v485_v42  ;;  %v417_v48 = vadd.f32 %v1362_v36, %v416_v46 }
 0x1ce   :  { %v519_v49 = vmul.f32 1.442695, %v502_v44  ;;  %v488_v50 = vmax.f32 %v422_v45, 0.0 }
 0x1cf   :  { %v517_v51 = vmul.f32 1.442695, %v501_v47  ;;  %v487_v52 = vmax.f32 %v417_v48, 0.0  ;;  %v1000_v53 = vpop.f32.mrb[20].mxu0 }
 0x1d0   :  { %1100 = vpow2.f32 %v519_v49  ;;  %v504_v54 = vsub.f32 0.0, %v488_v50  ;;  %v432_v55 = vadd.f32 %v1000_v53, %v1362_v36  ;;  %v426_v56 = vpop.f32.mrb[21].mxu0 }
 0x1d1   :  { %1102 = vpow2.f32 %v517_v51  ;;  %v503_v57 = vsub.f32 0.0, %v487_v52  ;;  %v427_v58 = vadd.f32 %v1362_v36, %v426_v56 }
 0x1d2   :  { %v523_v59 = vmul.f32 1.442695, %v504_v54  ;;  %v490_v60 = vmax.f32 %v432_v55, 0.0 }
 0x1d3   :  { %v521_v61 = vmul.f32 1.442695, %v503_v57  ;;  %v489_v62 = vmax.f32 %v427_v58, 0.0  ;;  %v1003_v63 = vpop.f32.mrb[0].mxu1 }
 0x1d4   :  { %1104 = vpow2.f32 %v523_v59  ;;  %v506_v0 = vsub.f32 0.0, %v490_v60  ;;  %v442_v1 = vadd.f32 %v1003_v63, %v1362_v36  ;;  %v436_v2 = vpop.f32.mrb[1].mxu1 }
 0x1d5   :  { %1106 = vpow2.f32 %v521_v61  ;;  %v505_v3 = vsub.f32 0.0, %v489_v62  ;;  %v437_v4 = vadd.f32 %v1362_v36, %v436_v2 }
 0x1d6   :  { %v527_v5 = vmul.f32 1.442695, %v506_v0  ;;  %v492_v6 = vmax.f32 %v442_v1, 0.0 }
 0x1d7   :  { %v525_v7 = vmul.f32 1.442695, %v505_v3  ;;  %v491_v8 = vmax.f32 %v437_v4, 0.0  ;;  %v1006_v9 = vpop.f32.mrb[2].mxu1 }
 0x1d8   :  { %1108 = vpow2.f32 %v527_v5  ;;  %v508_v10 = vsub.f32 0.0, %v492_v6  ;;  %v452_v11 = vadd.f32 %v1006_v9, %v1362_v36  ;;  %v446_v12 = vpop.f32.mrb[3].mxu1 }
 0x1d9   :  { %1110 = vpow2.f32 %v525_v7  ;;  %v507_v13 = vsub.f32 0.0, %v491_v8  ;;  %v447_v14 = vadd.f32 %v1362_v36, %v446_v12 }
 0x1da   :  { %v1101_v15 = vpop.eup %1100  ;;  %v531_v16 = vmul.f32 1.442695, %v508_v10  ;;  %v494_v17 = vmax.f32 %v452_v11, 0.0 }
 0x1db   :  { %v1103_v18 = vpop.eup %1102  ;;  %v550_v19 = vadd.f32 1.0, %v1101_v15  ;;  %v529_v20 = vmul.f32 1.442695, %v507_v13  ;;  %v493_v21 = vmax.f32 %v447_v14, 0.0  ;;  %v1009_v22 = vpop.f32.mrb[4].mxu1 }
 0x1dc   :  { %v549_v23 = vadd.f32 1.0, %v1103_v18  ;;  %1112 = vpow2.f32 %v531_v16  ;;  %v510_v24 = vsub.f32 0.0, %v494_v17  ;;  %v462_v25 = vadd.f32 %v1009_v22, %v1362_v36  ;;  %v456_v26 = vpop.f32.mrb[5].mxu1 }
 0x1dd   :  { %1114 = vrcp.f32 %v550_v19  ;;  %v509_v27 = vsub.f32 0.0, %v493_v21  ;;  %v457_v28 = vadd.f32 %v1362_v36, %v456_v26 }
 0x1de   :  { %v1105_v29 = vpop.eup %1104  ;;  %1116 = vrcp.f32 %v549_v23  ;;  %v535_v30 = vmul.f32 1.442695, %v510_v24  ;;  %v496_v31 = vmax.f32 %v462_v25, 0.0 }
 0x1df   :  { %v1107_v32 = vpop.eup %1106  ;;  %v552_v33 = vadd.f32 1.0, %v1105_v29  ;;  %1118 = vpow2.f32 %v529_v20  ;;  %v533_v34 = vmul.f32 1.442695, %v509_v27  ;;  %v495_v35 = vmax.f32 %v457_v28, 0.0  ;;  %v1012_v37 = vpop.f32.mrb[6].mxu1 }
 0x1e0   :  { %v551_v38 = vadd.f32 1.0, %v1107_v32  ;;  %1120 = vpow2.f32 %v535_v30  ;;  %v512_v39 = vsub.f32 0.0, %v496_v31  ;;  %v472_v40 = vadd.f32 %v1012_v37, %v1362_v36  ;;  %v466_v41 = vpop.f32.mrb[7].mxu1 }
 0x1e1   :  { %1122 = vrcp.f32 %v552_v33  ;;  %v511_v42 = vsub.f32 0.0, %v495_v35  ;;  %v467_v43 = vadd.f32 %v1362_v36, %v466_v41 }
 0x1e2   :  { %v1109_v44 = vpop.eup %1108  ;;  %1124 = vrcp.f32 %v551_v38  ;;  %v539_v45 = vmul.f32 1.442695, %v512_v39  ;;  %v498_v46 = vmax.f32 %v472_v40, 0.0  ;;  %v842_v38 = vld [vmem:[#allocation2] ss:$0 sm:$0xff] }
 0x1e3   :  { %v1111_v47 = vpop.eup %1110  ;;  %v554_v48 = vadd.f32 1.0, %v1109_v44  ;;  %1126 = vpow2.f32 %v533_v34  ;;  %v537_v49 = vmul.f32 1.442695, %v511_v42  ;;  %v497_v50 = vmax.f32 %v467_v43, 0.0  ;;  %v1015_v51 = vpop.f32.mrb[8].mxu1 }
 0x1e4   :  { %v553_v52 = vadd.f32 1.0, %v1111_v47  ;;  %1128 = vpow2.f32 %v539_v45  ;;  %v514_v53 = vsub.f32 0.0, %v498_v46  ;;  %v482_v54 = vadd.f32 %v1015_v51, %v1362_v36  ;;  %v476_v55 = vpop.f32.mrb[9].mxu1 }
 0x1e5   :  { %1130 = vrcp.f32 %v554_v48  ;;  %v513_v56 = vsub.f32 0.0, %v497_v50  ;;  %v477_v57 = vadd.f32 %v1362_v36, %v476_v55 }
 0x1e6   :  { %v1113_v58 = vpop.eup %1112  ;;  %1132 = vrcp.f32 %v553_v52  ;;  %v543_v59 = vmul.f32 1.442695, %v514_v53  ;;  %v500_v60 = vmax.f32 %v482_v54, 0.0 }
 0x1e7   :  { %v1115_v61 = vpop.eup %1114  ;;  %1134 = vpow2.f32 %v537_v49  ;;  %v541_v62 = vmul.f32 1.442695, %v513_v56  ;;  %v499_v63 = vmax.f32 %v477_v57, 0.0  ;;  %v556_v3 = vadd.f32 1.0, %v1113_v58 }
 0x1e8   :  { %v1117_v0 = vpop.eup %1116  ;;  %1136 = vpow2.f32 %v543_v59  ;;  %v516_v1 = vsub.f32 0.0, %v500_v60 }
 0x1e9   :  { %v1119_v2 = vpop.eup %1118  ;;  %v515_v4 = vsub.f32 0.0, %v499_v63  ;;  %1024 = vmatprep.mubr.msk.f32.mxu1 %vm592_vm3, %v1117_v0  ;;  %1138 = vpow2.f32 %v541_v62 }
 0x1ea   :  { %v1121_v5 = vpop.eup %1120  ;;  %v555_v6 = vadd.f32 1.0, %v1119_v2  ;;  %v547_v36 = vmul.f32 1.442695, %v516_v1  ;;  %1025 = vmatmul.mubr.msk.f32.vlgmr.msra.gmra.mrb[10].mxu1 %vm592_vm3, %v1115_v61 }
 0x1eb   :  { %v1123_v7 = vpop.eup %1122  ;;  %v545_v8 = vmul.f32 1.442695, %v515_v4  ;;  %v558_v11 = vadd.f32 1.0, %v1121_v5 }
 0x1ec   :  { %v1125_v9 = vpop.eup %1124  ;;  %1140 = vrcp.f32 %v555_v6 }
 0x1ed   :  { %v1127_v10 = vpop.eup %1126  ;;  %1142 = vrcp.f32 %v556_v3  ;;  %1027 = vmatprep.mubr.msk.f32.mxu1 %vm592_vm3, %v1125_v9 }
 0x1ee   :  { %v1129_v12 = vpop.eup %1128  ;;  %v557_v13 = vadd.f32 1.0, %v1127_v10  ;;  %1144 = vpow2.f32 %v547_v36  ;;  %1028 = vmatmul.mubr.msk.f32.gmra.mrb[12].mxu1 %vm592_vm3, %v1123_v7 }
 0x1ef   :  { %v1131_v14 = vpop.eup %1130  ;;  %1146 = vpow2.f32 %v545_v8  ;;  %v560_v17 = vadd.f32 1.0, %v1129_v12 }
 0x1f0   :  { %v1133_v15 = vpop.eup %1132  ;;  %1148 = vrcp.f32 %v557_v13 }
 0x1f1   :  { %v1135_v16 = vpop.eup %1134  ;;  %1150 = vrcp.f32 %v558_v11  ;;  %1030 = vmatprep.mubr.msk.f32.mxu1 %vm592_vm3, %v1133_v15 }
 0x1f2   :  { %v1137_v18 = vpop.eup %1136  ;;  %v559_v19 = vadd.f32 1.0, %v1135_v16  ;;  %1031 = vmatmul.mubr.msk.f32.gmra.mrb[14].mxu1 %vm592_vm3, %v1131_v14 }
 0x1f3   :  { %v1139_v20 = vpop.eup %1138  ;;  %v562_v21 = vadd.f32 1.0, %v1137_v18 }
 0x1f4   :  { %1152 = vrcp.f32 %v559_v19  ;;  %v561_v22 = vadd.f32 1.0, %v1139_v20 }
 0x1f5   :  { %1154 = vrcp.f32 %v560_v17 }
 0x1f6   :  { %v1141_v23 = vpop.eup %1140  ;;  %1156 = vrcp.f32 %v561_v22 }
 0x1f7   :  { %v1143_v24 = vpop.eup %1142  ;;  %1033 = vmatprep.mubr.msk.f32.mxu1 %vm592_vm3, %v1141_v23  ;;  %1158 = vrcp.f32 %v562_v21 }
 0x1f8   :  { %v1145_v25 = vpop.eup %1144  ;;  %1034 = vmatmul.mubr.msk.f32.gmra.mrb[16].mxu1 %vm592_vm3, %v1143_v24 }
 0x1f9   :  { %v1147_v26 = vpop.eup %1146  ;;  %v564_v27 = vadd.f32 1.0, %v1145_v25 }
 0x1fa   :  { %v1149_v28 = vpop.eup %1148  ;;  %v563_v29 = vadd.f32 1.0, %v1147_v26 }
 0x1fb   :  { %v1151_v30 = vpop.eup %1150  ;;  %1036 = vmatprep.mubr.msk.f32.mxu1 %vm592_vm3, %v1149_v28 }
 0x1fc   :  { %1160 = vrcp.f32 %v563_v29  ;;  %1037 = vmatmul.mubr.msk.f32.gmra.mrb[18].mxu1 %vm592_vm3, %v1151_v30 }
 0x1fd   :  { %1162 = vrcp.f32 %v564_v27 }
 0x1fe   :  { %v1153_v31 = vpop.eup %1152 }
 0x1ff   :  { %v1155_v32 = vpop.eup %1154  ;;  %1039 = vmatprep.mubr.msk.f32.mxu1 %vm592_vm3, %v1153_v31 }
 0x200   :  { %1040 = vmatmul.mubr.msk.f32.gmra.mrb[20].mxu1 %vm592_vm3, %v1155_v32  ;;  %v1157_v33 = vpop.eup %1156 }
 0x201   :  { %1042 = vmatprep.mubr.msk.f32.mxu1 %vm592_vm3, %v1157_v33  ;;  %v1159_v34 = vpop.eup %1158 }
 0x204   :  { %1043 = vmatmul.mubr.msk.f32.gmra.mrb[22].mxu1 %vm592_vm3, %v1159_v34 }
 0x206   :  { %v1161_v35 = vpop.eup %1160 }
 0x207   :  { %v1163_v37 = vpop.eup %1162  ;;  %1045 = vmatprep.mubr.msk.f32.mxu1 %vm592_vm3, %v1161_v35 }
 0x208   :  { %1046 = vmatmul.mubr.msk.f32.gmra.mrb[24].mxu1 %vm592_vm3, %v1163_v37 }
 0x2bd   :  { %v1026_v39 = vpop.f32.mrb[10].mxu1 }
 0x2be   :  { %v713_v40 = vadd.f32 %v1026_v39, %v842_v38  ;;  %v707_v41 = vpop.f32.mrb[11].mxu1 }
 0x2bf   :  { %v708_v42 = vadd.f32 %v842_v38, %v707_v41 }
 0x2c0   :  { %788 = vst.msk [vmem:[%s1467_s7 + $0x8] sm:$0xff] %vm786_vm4, %v713_v40 }
 0x2c1   :  { %787 = vst.msk [vmem:[%s1467_s7] sm:$0xff] %vm786_vm4, %v708_v42  ;;  %v1029_v43 = vpop.f32.mrb[12].mxu1 }
 0x2c2   :  { %v723_v44 = vadd.f32 %v1029_v43, %v842_v38  ;;  %v717_v45 = vpop.f32.mrb[13].mxu1 }
 0x2c3   :  { %v718_v46 = vadd.f32 %v842_v38, %v717_v45 }
 0x2c4   :  { %790 = vst.msk [vmem:[%s1467_s7 + $0x18] sm:$0xff] %vm786_vm4, %v723_v44 }
 0x2c5   :  { %789 = vst.msk [vmem:[%s1467_s7 + $0x10] sm:$0xff] %vm786_vm4, %v718_v46  ;;  %v1032_v47 = vpop.f32.mrb[14].mxu1 }
 0x2c6   :  { %v733_v48 = vadd.f32 %v1032_v47, %v842_v38  ;;  %v727_v49 = vpop.f32.mrb[15].mxu1 }
 0x2c7   :  { %v728_v50 = vadd.f32 %v842_v38, %v727_v49 }
 0x2c8   :  { %792 = vst.msk [vmem:[%s1467_s7 + $0x28] sm:$0xff] %vm786_vm4, %v733_v48 }
 0x2c9   :  { %791 = vst.msk [vmem:[%s1467_s7 + $0x20] sm:$0xff] %vm786_vm4, %v728_v50 }
 0x2cb   :  { %v1035_v51 = vpop.f32.mrb[16].mxu1 }
 0x2cc   :  { %v743_v52 = vadd.f32 %v1035_v51, %v842_v38  ;;  %v737_v53 = vpop.f32.mrb[17].mxu1 }
 0x2cd   :  { %v738_v54 = vadd.f32 %v842_v38, %v737_v53 }
 0x2ce   :  { %794 = vst.msk [vmem:[%s1467_s7 + $0x38] sm:$0xff] %vm786_vm4, %v743_v52 }
 0x2cf   :  { %793 = vst.msk [vmem:[%s1467_s7 + $0x30] sm:$0xff] %vm786_vm4, %v738_v54  ;;  %v1038_v55 = vpop.f32.mrb[18].mxu1 }
 0x2d0   :  { %v753_v56 = vadd.f32 %v1038_v55, %v842_v38  ;;  %v747_v57 = vpop.f32.mrb[19].mxu1 }
 0x2d1   :  { %v748_v58 = vadd.f32 %v842_v38, %v747_v57 }
 0x2d2   :  { %796 = vst.msk [vmem:[%s1467_s7 + $0x48] sm:$0xff] %vm786_vm4, %v753_v56 }
 0x2d3   :  { %795 = vst.msk [vmem:[%s1467_s7 + $0x40] sm:$0xff] %vm786_vm4, %v748_v58  ;;  %v1041_v59 = vpop.f32.mrb[20].mxu1 }
 0x2d4   :  { %v763_v60 = vadd.f32 %v1041_v59, %v842_v38  ;;  %v757_v61 = vpop.f32.mrb[21].mxu1 }
 0x2d5   :  { %v758_v62 = vadd.f32 %v842_v38, %v757_v61 }
 0x2d6   :  { %798 = vst.msk [vmem:[%s1467_s7 + $0x58] sm:$0xff] %vm786_vm4, %v763_v60 }
 0x2d7   :  { %797 = vst.msk [vmem:[%s1467_s7 + $0x50] sm:$0xff] %vm786_vm4, %v758_v62  ;;  %v1044_v63 = vpop.f32.mrb[22].mxu1 }
 0x2d8   :  { %v773_v0 = vadd.f32 %v1044_v63, %v842_v38  ;;  %v767_v1 = vpop.f32.mrb[23].mxu1 }
 0x2d9   :  { %v768_v2 = vadd.f32 %v842_v38, %v767_v1 }
 0x2da   :  { %800 = vst.msk [vmem:[%s1467_s7 + $0x68] sm:$0xff] %vm786_vm4, %v773_v0 }
 0x2db   :  { %799 = vst.msk [vmem:[%s1467_s7 + $0x60] sm:$0xff] %vm786_vm4, %v768_v2  ;;  %v1047_v3 = vpop.f32.mrb[24].mxu1 }
 0x2dc   :  { %v783_v4 = vadd.f32 %v1047_v3, %v842_v38  ;;  %v777_v5 = vpop.f32.mrb[25].mxu1 }
 0x2dd   :  { %v778_v6 = vadd.f32 %v842_v38, %v777_v5 }
 0x2de   :  { %802 = vst.msk [vmem:[%s1467_s7 + $0x78] sm:$0xff] %vm786_vm4, %v783_v4 }
 0x2df   :  { %801 = vst.msk [vmem:[%s1467_s7 + $0x70] sm:$0xff] %vm786_vm4, %v778_v6 }

</bundles_post_ra>
